<compile_context>
chip_gen: v5e
topology: v5e:2x2
jax: 0.10.0
libtpu: 0.0.40
codegen_flags: <defaults>
</compile_context>

<pallas_src>
import functools
import math

import jax
import jax.numpy as jnp
from jax.experimental import pallas as pl
from jax.experimental.pallas import tpu as pltpu


def _cross_attention_kernel(x_ref, y_ref, wq_ref, wk_ref, wv_ref, o_ref, *, bb, nq, nk):
    # x_ref : (bb*nq, Dqp)  bf16      y_ref : (bb*nk, Dinp) bf16
    # wq_ref: (Dqp, Dp)     bf16      wk_ref: (Dinp, Dp)    bf16 (both pre-transposed)
    # wv_ref: (Dp, Dp)      bf16 (pre-transposed; contracts against k)
    # o_ref : (bb*nq, Dp)   f32
    dp = wq_ref.shape[-1]

    # Projections: one tall 2-D matmul per block (bf16 operands, f32 accumulate).
    # 1/sqrt(out_dim) is already folded into wq, so q needs no extra scaling.
    q2 = jnp.dot(x_ref[...], wq_ref[...], preferred_element_type=jnp.float32)   # (bb*nq, Dp)
    k2 = jnp.dot(y_ref[...], wk_ref[...], preferred_element_type=jnp.float32)   # (bb*nk, Dp)
    k2_bf = k2.astype(jnp.bfloat16)
    # V = value(key(y)) -- faithful to the reference (v is computed from k, not y).
    v2 = jnp.dot(k2_bf, wv_ref[...], preferred_element_type=jnp.float32)        # (bb*nk, Dp)

    q3 = q2.astype(jnp.bfloat16).reshape(bb, nq, dp)
    k3 = k2_bf.reshape(bb, nk, dp)
    v3 = v2.astype(jnp.bfloat16).reshape(bb, nk, dp)

    # Scores: batched dot_general contracting on the (shared, padded) feature dim;
    # no materialized transpose of k.
    s = jnp.einsum("bqd,bkd->bqk", q3, k3, preferred_element_type=jnp.float32)  # (bb, nq, nk)

    # Softmax in f32 (keep elementwise math off the bf16 path; v5e has no bf16 VPU/EUP).
    m = jnp.max(s, axis=-1, keepdims=True)
    e = jnp.exp(s - m)
    denom = jnp.sum(e, axis=-1, keepdims=True)
    attn = e * pl.reciprocal(denom, approx=True)

    # TODO(synk): for very large Nk, tile Nk with an online-softmax (flash-style) inner
    # loop instead of materializing the full (nq, nk) scores tile (v7x 64 MiB VMEM).
    out = jnp.einsum("bqk,bkd->bqd", attn.astype(jnp.bfloat16), v3,
                     preferred_element_type=jnp.float32)                        # (bb, nq, Dp)
    o_ref[...] = out.reshape(bb * nq, dp).astype(o_ref.dtype)


@functools.partial(jax.jit, static_argnames=("block_b",))
def cross_attention(x, y, wq, wk, wv, *, block_b=8):
    """x: (B, Nq, in_q_dim), y: (B, Nk, in_dim)
       wq: (hid_q_dim, in_q_dim), wk, wv: (out_dim, in_dim)  (torch.nn.Linear layout)
       returns: (B, Nq, out_dim)"""
    B, Nq, Dq = x.shape
    By, Nk, Din = y.shape
    assert By == B
    Hq, Dq_w = wq.shape
    Dout, Din_w = wk.shape
    assert Dq_w == Dq and Din_w == Din and wv.shape == (Dout, Din)
    assert Hq == Dout, "score matmul requires hid_q_dim == out_dim"
    # The reference computes V = value(key(y)); this only works when in_dim == out_dim.
    assert Din == Dout, "value(key(y)) requires in_dim == out_dim"

    def rup(n, m):
        return (n + m - 1) // m * m

    Dqp = rup(Dq, 128)     # padded query input features
    Dinp = rup(Din, 128)   # padded key/value input features
    Dp = rup(Dout, 128)    # padded hid_q_dim / out_dim (equal by assertion)

    # Batch blocking: largest divisor of B that is <= block_b.  When the grid has more
    # than one step, also require sublane-aligned row blocks (the (8,128) rule).
    bb = 1
    for d in range(1, min(B, block_b) + 1):
        if B % d != 0:
            continue
        if B // d > 1 and ((d * Nq) % 8 != 0 or (d * Nk) % 8 != 0):
            continue
        bb = d
    nb = B // bb

    scale = 1.0 / math.sqrt(Dout)   # fold 1/sqrt(out_dim) into Wq (q only feeds the scores)

    # Pre-transpose weights to (in_features, out_features), pad to lane-dense 128
    # multiples, cast to bf16 once in the wrapper.
    def prep_w(w, rows, cols, s=1.0):
        wt = (w * s).T
        wt = jnp.pad(wt, ((0, rows - wt.shape[0]), (0, cols - wt.shape[1])))
        return wt.astype(jnp.bfloat16)

    wq_t = prep_w(wq, Dqp, Dp, s=scale)   # (Dqp, Dp)
    wk_t = prep_w(wk, Dinp, Dp)           # (Dinp, Dp)
    wv_t = prep_w(wv, Dp, Dp)             # contracts against k, which lives in Dp space

    # Pad features, flatten batch into the row dim (lane/sublane-dense blocks, no
    # in-kernel repacking of the bf16 inputs), cast to bf16.
    xf = jnp.pad(x, ((0, 0), (0, 0), (0, Dqp - Dq))).astype(jnp.bfloat16).reshape(B * Nq, Dqp)
    yf = jnp.pad(y, ((0, 0), (0, 0), (0, Dinp - Din))).astype(jnp.bfloat16).reshape(B * Nk, Dinp)

    kernel = functools.partial(_cross_attention_kernel, bb=bb, nq=Nq, nk=Nk)

    flops = 2 * B * (Nq * Dqp * Dp + Nk * Dinp * Dp + Nk * Dp * Dp
                     + Nq * Nk * Dp + Nq * Nk * Dp)
    bytes_accessed = (2 * (xf.size + yf.size + nb * (wq_t.size + wk_t.size + wv_t.size))
                      + 4 * B * Nq * Dp)
    cost = pl.CostEstimate(flops=flops,
                           transcendentals=B * Nq * Nk,
                           bytes_accessed=bytes_accessed)

    out = pl.pallas_call(
        kernel,
        out_shape=jax.ShapeDtypeStruct((B * Nq, Dp), jnp.float32),
        grid_spec=pltpu.PrefetchScalarGridSpec(
            num_scalar_prefetch=0,
            grid=(nb,),
            in_specs=[
                pl.BlockSpec((bb * Nq, Dqp), lambda b: (b, 0)),   # x rows for this batch block
                pl.BlockSpec((bb * Nk, Dinp), lambda b: (b, 0)),  # y rows for this batch block
                pl.BlockSpec((Dqp, Dp), lambda b: (0, 0)),        # Wq^T (whole, resident)
                pl.BlockSpec((Dinp, Dp), lambda b: (0, 0)),       # Wk^T (whole, resident)
                pl.BlockSpec((Dp, Dp), lambda b: (0, 0)),         # Wv^T (whole, resident)
            ],
            out_specs=pl.BlockSpec((bb * Nq, Dp), lambda b: (b, 0)),
        ),
        compiler_params=pltpu.CompilerParams(
            dimension_semantics=("parallel",),
            vmem_limit_bytes=32 * 1024 * 1024,
        ),
        cost_estimate=cost,
    )(xf, yf, wq_t, wk_t, wv_t)

    # Slice off feature padding, restore (B, Nq, out_dim).
    return out[:, :Dout].reshape(B, Nq, Dout).astype(x.dtype)


def cross_attention_ref(x, y, wq, wk, wv):
    """Pure-JAX f32 reference mirroring the PyTorch forward exactly."""
    out_dim = wk.shape[0]
    q = jnp.einsum("bnd,hd->bnh", x, wq)
    k = jnp.einsum("bnd,od->bno", y, wk)                    # y <- key(y)
    scores = jnp.einsum("bnh,bmh->bnm", q, k) / math.sqrt(out_dim)
    attn = jax.nn.softmax(scores, axis=-1)
    v = jnp.einsum("bno,po->bnp", k, wv)                    # value(key(y))
    return jnp.einsum("bnm,bmo->bno", attn, v)


if __name__ == "__main__":
    # Small shapes consistent with the module constraints:
    #   in_dim == out_dim == hid_q_dim (required by the reference forward),
    #   in_q_dim may differ.
    B, Nq, Nk = 2, 8, 16
    in_q_dim = 24
    in_dim = out_dim = hid_q_dim = 32

    key = jax.random.PRNGKey(0)
    kx, ky, k1, k2, k3 = jax.random.split(key, 5)

    x = jax.random.normal(kx, (B, Nq, in_q_dim), dtype=jnp.float32)
    y = jax.random.normal(ky, (B, Nk, in_dim), dtype=jnp.float32)

    # Deterministic parameter init (torch.nn.Linear-style uniform(-1/sqrt(fan_in), ...)).
    def linear_init(k, out_f, in_f):
        bound = 1.0 / math.sqrt(in_f)
        return jax.random.uniform(k, (out_f, in_f), jnp.float32, -bound, bound)

    wq = linear_init(k1, hid_q_dim, in_q_dim)
    wk = linear_init(k2, out_dim, in_dim)
    wv = linear_init(k3, out_dim, in_dim)

    out = cross_attention(x, y, wq, wk, wv)
    out = jax.block_until_ready(out)

    ref = cross_attention_ref(x, y, wq, wk, wv)
    assert out.shape == (B, Nq, out_dim)
    # bf16 MXU operands (f32 accumulation) + approx reciprocal -> slightly looser tolerance.
    assert jnp.allclose(out, ref, atol=5e-2, rtol=5e-2), float(jnp.max(jnp.abs(out - ref)))

    print("KERNEL_OK")
</pallas_src>

<mosaic_0001>
module attributes {stable_mosaic.version = 11 : i64} {
  func.func @_cross_attention_kernel(%arg0: i32, %arg1: memref<16x128xbf16, #tpu.memory_space<vmem>>, %arg2: memref<32x128xbf16, #tpu.memory_space<vmem>>, %arg3: memref<128x128xbf16, #tpu.memory_space<vmem>>, %arg4: memref<128x128xbf16, #tpu.memory_space<vmem>>, %arg5: memref<128x128xbf16, #tpu.memory_space<vmem>>, %arg6: memref<16x128xf32, #tpu.memory_space<vmem>>) attributes {dimension_semantics = [#tpu.dimension_semantics<parallel>], iteration_bounds = array<i64: 1>, scalar_prefetch = 0 : i64, scratch_operands = 0 : i64, tpu.core_type = #tpu.core_type<tc>, window_params = [{transform_indices = @transform_0, window_bounds = array<i64: 16, 128>}, {transform_indices = @transform_1, window_bounds = array<i64: 32, 128>}, {pipeline_mode = #tpu.pipeline_mode<synchronous>, transform_indices = @transform_2, window_bounds = array<i64: 128, 128>}, {pipeline_mode = #tpu.pipeline_mode<synchronous>, transform_indices = @transform_3, window_bounds = array<i64: 128, 128>}, {pipeline_mode = #tpu.pipeline_mode<synchronous>, transform_indices = @transform_4, window_bounds = array<i64: 128, 128>}, {transform_indices = @transform_5, window_bounds = array<i64: 16, 128>}]} {
    %c0 = arith.constant 0 : index
    %c0_0 = arith.constant 0 : index
    %0 = vector.load %arg1[%c0, %c0_0] : memref<16x128xbf16, #tpu.memory_space<vmem>>, vector<16x128xbf16>
    %c0_1 = arith.constant 0 : index
    %c0_2 = arith.constant 0 : index
    %1 = vector.load %arg3[%c0_1, %c0_2] : memref<128x128xbf16, #tpu.memory_space<vmem>>, vector<128x128xbf16>
    %cst = arith.constant dense<0.000000e+00> : vector<16x128xf32>
    %2 = tpu.matmul %0, %1, %cst {dimension_numbers = #tpu.dot_dimension_numbers<[1], [0], [0], [1], [0, 0, 1, 1], [], []>} : vector<16x128xbf16>, vector<128x128xbf16>, vector<16x128xf32> -> vector<16x128xf32>
    %c0_3 = arith.constant 0 : index
    %c0_4 = arith.constant 0 : index
    %3 = vector.load %arg2[%c0_3, %c0_4] : memref<32x128xbf16, #tpu.memory_space<vmem>>, vector<32x128xbf16>
    %c0_5 = arith.constant 0 : index
    %c0_6 = arith.constant 0 : index
    %4 = vector.load %arg4[%c0_5, %c0_6] : memref<128x128xbf16, #tpu.memory_space<vmem>>, vector<128x128xbf16>
    %cst_7 = arith.constant dense<0.000000e+00> : vector<32x128xf32>
    %5 = tpu.matmul %3, %4, %cst_7 {dimension_numbers = #tpu.dot_dimension_numbers<[1], [0], [0], [1], [0, 0, 1, 1], [], []>} : vector<32x128xbf16>, vector<128x128xbf16>, vector<32x128xf32> -> vector<32x128xf32>
    %6 = arith.truncf %5 : vector<32x128xf32> to vector<32x128xbf16>
    %c0_8 = arith.constant 0 : index
    %c0_9 = arith.constant 0 : index
    %7 = vector.load %arg5[%c0_8, %c0_9] : memref<128x128xbf16, #tpu.memory_space<vmem>>, vector<128x128xbf16>
    %cst_10 = arith.constant dense<0.000000e+00> : vector<32x128xf32>
    %8 = tpu.matmul %6, %7, %cst_10 {dimension_numbers = #tpu.dot_dimension_numbers<[1], [0], [0], [1], [0, 0, 1, 1], [], []>} : vector<32x128xbf16>, vector<128x128xbf16>, vector<32x128xf32> -> vector<32x128xf32>
    %9 = arith.truncf %2 : vector<16x128xf32> to vector<16x128xbf16>
    %10 = vector.shape_cast %9 : vector<16x128xbf16> to vector<2x8x128xbf16>
    %11 = vector.shape_cast %6 : vector<32x128xbf16> to vector<2x16x128xbf16>
    %12 = arith.truncf %8 : vector<32x128xf32> to vector<32x128xbf16>
    %13 = vector.shape_cast %12 : vector<32x128xbf16> to vector<2x16x128xbf16>
    "tpu.trace_start"() <{level = 10 : i32, message = "bqd,bkd->bqk"}> : () -> ()
    %cst_11 = arith.constant dense<0.000000e+00> : vector<2x8x16xf32>
    %14 = tpu.matmul %10, %11, %cst_11 {dimension_numbers = #tpu.dot_dimension_numbers<[2], [2], [1], [1], [0, 0, 0, 1, 1, 1], [0], [0]>} : vector<2x8x128xbf16>, vector<2x16x128xbf16>, vector<2x8x16xf32> -> vector<2x8x16xf32>
    "tpu.trace_stop"() : () -> ()
    %cst_12 = arith.constant dense<0xFF800000> : vector<2x8xf32>
    %15 = vector.multi_reduction <maximumf>, %14, %cst_12 [2] : vector<2x8x16xf32> to vector<2x8xf32>
    %16 = vector.shape_cast %15 : vector<2x8xf32> to vector<2x8x1xf32>
    %17 = vector.broadcast %16 : vector<2x8x1xf32> to vector<2x8x16xf32>
    %18 = arith.subf %14, %17 : vector<2x8x16xf32>
    %19 = math.exp %18 : vector<2x8x16xf32>
    %cst_13 = arith.constant dense<0.000000e+00> : vector<2x8xf32>
    %20 = vector.multi_reduction <add>, %19, %cst_13 [2] : vector<2x8x16xf32> to vector<2x8xf32>
    %21 = vector.shape_cast %20 : vector<2x8xf32> to vector<2x8x1xf32>
    %22 = tpu.reciprocal %21 {approx = true} : vector<2x8x1xf32> -> vector<2x8x1xf32>
    %23 = vector.broadcast %22 : vector<2x8x1xf32> to vector<2x8x16xf32>
    %24 = arith.mulf %19, %23 : vector<2x8x16xf32>
    %25 = arith.truncf %24 : vector<2x8x16xf32> to vector<2x8x16xbf16>
    "tpu.trace_start"() <{level = 10 : i32, message = "bqk,bkd->bqd"}> : () -> ()
    %cst_14 = arith.constant dense<0.000000e+00> : vector<2x8x128xf32>
    %26 = tpu.matmul %25, %13, %cst_14 {dimension_numbers = #tpu.dot_dimension_numbers<[2], [1], [1], [2], [0, 0, 0, 1, 1, 2], [0], [0]>} : vector<2x8x16xbf16>, vector<2x16x128xbf16>, vector<2x8x128xf32> -> vector<2x8x128xf32>
    "tpu.trace_stop"() : () -> ()
    %27 = vector.shape_cast %26 : vector<2x8x128xf32> to vector<16x128xf32>
    %c0_15 = arith.constant 0 : index
    %c0_16 = arith.constant 0 : index
    %28 = vector.load %arg6[%c0_15, %c0_16] : memref<16x128xf32, #tpu.memory_space<vmem>>, vector<16x128xf32>
    tpu.vector_store %arg6[%c0_15, %c0_16], %27 {strides = array<i32>} : memref<16x128xf32, #tpu.memory_space<vmem>>, vector<16x128xf32>,
    return
  }
  func.func @transform_0(%arg0: i32) -> (i32, i32) {
    %c0_i32 = arith.constant 0 : i32
    %c0_i32_0 = arith.constant 0 : i32
    return %arg0, %c0_i32 : i32, i32
  }
  func.func @transform_1(%arg0: i32) -> (i32, i32) {
    %c0_i32 = arith.constant 0 : i32
    %c0_i32_0 = arith.constant 0 : i32
    return %arg0, %c0_i32 : i32, i32
  }
  func.func @transform_2(%arg0: i32) -> (i32, i32) {
    %c0_i32 = arith.constant 0 : i32
    %c0_i32_0 = arith.constant 0 : i32
    %c0_i32_1 = arith.constant 0 : i32
    return %c0_i32, %c0_i32_0 : i32, i32
  }
  func.func @transform_3(%arg0: i32) -> (i32, i32) {
    %c0_i32 = arith.constant 0 : i32
    %c0_i32_0 = arith.constant 0 : i32
    %c0_i32_1 = arith.constant 0 : i32
    return %c0_i32, %c0_i32_0 : i32, i32
  }
  func.func @transform_4(%arg0: i32) -> (i32, i32) {
    %c0_i32 = arith.constant 0 : i32
    %c0_i32_0 = arith.constant 0 : i32
    %c0_i32_1 = arith.constant 0 : i32
    return %c0_i32, %c0_i32_0 : i32, i32
  }
  func.func @transform_5(%arg0: i32) -> (i32, i32) {
    %c0_i32 = arith.constant 0 : i32
    %c0_i32_0 = arith.constant 0 : i32
    return %arg0, %c0_i32 : i32, i32
  }
}

</mosaic_0001>

<bundles_post_ra>
// kernel: cross_attention.1
= control target key start
LH: loop header
LB: loop body
LE: loop exit
PB: predicated region body
PF: predicated region fallthrough
CT: control target
= control target key end

     0   :  { %vm337_vm0 = vcmask 130048   ;;  %s680_s3 = inlined_call_operand.vmem [shape: bf16[128,128], index: 3, kind: input, shape index: {}]   ;;  %s681_s2 = inlined_call_operand.vmem [shape: bf16[128,128], index: 2, kind: input, shape index: {}]   ;;  %s682_s4 = inlined_call_operand.vmem [shape: bf16[128,128], index: 4, kind: input, shape index: {}]   ;;  %s683_s1 = inlined_call_operand.vmem [shape: bf16[32,128], index: 1, kind: input, shape index: {}]   ;;  %s684_s0 = inlined_call_operand.vmem [shape: bf16[16,128], index: 0, kind: input, shape index: {}]   ;;  %s685_s5 = inlined_call_operand.vmem [shape: f32[16,128], index: 5, kind: output, shape index: {}]  }
   0x1   :  { %v540_v0 = vld [vmem:[%s680_s3 + $0x38] sm:$0xff]  ;;  %v539_v2 = vld [vmem:[%s680_s3 + $0x30] sm:$0xff]  ;;  %v538_v4 = vld [vmem:[%s680_s3 + $0x28] sm:$0xff] }
   0x2   :  { %v530_v1 = vld [vmem:[%s681_s2 + $0x38] sm:$0xff]  ;;  %187 = vmatpush.bf16.msra.mxu1 %v540_v0  ;;  %v529_v3 = vld [vmem:[%s681_s2 + $0x30] sm:$0xff]  ;;  %v528_v5 = vld [vmem:[%s681_s2 + $0x28] sm:$0xff] }
   0x3   :  { %93 = vmatpush.bf16.msra.mxu0 %v530_v1  ;;  %v537_v6 = vld [vmem:[%s680_s3 + $0x20] sm:$0xff]  ;;  %v536_v8 = vld [vmem:[%s680_s3 + $0x18] sm:$0xff]  ;;  %v535_v11 = vld [vmem:[%s680_s3 + $0x10] sm:$0xff] }
   0x4   :  { %v527_v7 = vld [vmem:[%s681_s2 + $0x20] sm:$0xff]  ;;  %v526_v9 = vld [vmem:[%s681_s2 + $0x18] sm:$0xff]  ;;  %v525_v12 = vld [vmem:[%s681_s2 + $0x10] sm:$0xff] }
   0x5   :  { %v548_v10 = vld [vmem:[%s682_s4 + $0x38] sm:$0xff]  ;;  %v547_v13 = vld [vmem:[%s682_s4 + $0x30] sm:$0xff]  ;;  %v534_v14 = vld [vmem:[%s680_s3 + $0x8] sm:$0xff] }
   0x6   :  { %188 = vmatpush.bf16.msra.mxu1 %v539_v2  ;;  %286 = vmatpush.bf16.msra.mxu2 %v548_v10  ;;  %v524_v15 = vld [vmem:[%s681_s2 + $0x8] sm:$0xff]  ;;  %v533_v17 = vld [vmem:[%s680_s3] sm:$0xff]  ;;  %v544_v23 = vld [vmem:[%s682_s4 + $0x18] sm:$0xff] }
   0x7   :  { %94 = vmatpush.bf16.msra.mxu0 %v529_v3  ;;  %v546_v16 = vld [vmem:[%s682_s4 + $0x28] sm:$0xff]  ;;  %v523_v18 = vld [vmem:[%s681_s2] sm:$0xff]  ;;  %v543_v24 = vld [vmem:[%s682_s4 + $0x10] sm:$0xff] }
   0x8   :  { %v545_v19 = vld [vmem:[%s682_s4 + $0x20] sm:$0xff]  ;;  %v532_v22 = vld [vmem:[%s683_s1 + $0x8] sm:$0xff] }
   0x9   :  { %v531_v20 = vld [vmem:[%s683_s1] sm:$0xff]  ;;  %v542_v25 = vld [vmem:[%s682_s4 + $0x8] sm:$0xff] }
   0xa   :  { %189 = vmatpush.bf16.msra.mxu1 %v538_v4  ;;  %287 = vmatpush.bf16.msra.mxu2 %v547_v13  ;;  %v522_v21 = vld [vmem:[%s684_s0] sm:$0xff] }
   0xb   :  { %95 = vmatpush.bf16.msra.mxu0 %v528_v5  ;;  %v541_v26 = vld [vmem:[%s682_s4] sm:$0xff] }
   0xe   :  { %190 = vmatpush.bf16.msra.mxu1 %v537_v6  ;;  %288 = vmatpush.bf16.msra.mxu2 %v546_v16 }
   0xf   :  { %96 = vmatpush.bf16.msra.mxu0 %v527_v7 }
  0x12   :  { %191 = vmatpush.bf16.msra.mxu1 %v536_v8  ;;  %289 = vmatpush.bf16.msra.mxu2 %v545_v19 }
  0x13   :  { %97 = vmatpush.bf16.msra.mxu0 %v526_v9 }
  0x16   :  { %192 = vmatpush.bf16.msra.mxu1 %v535_v11  ;;  %290 = vmatpush.bf16.msra.mxu2 %v544_v23 }
  0x17   :  { %98 = vmatpush.bf16.msra.mxu0 %v525_v12 }
  0x1a   :  { %193 = vmatpush.bf16.msra.mxu1 %v534_v14  ;;  %291 = vmatpush.bf16.msra.mxu2 %v543_v24 }
  0x1b   :  { %99 = vmatpush.bf16.msra.mxu0 %v524_v15 }
  0x1e   :  { %194 = vmatpush.bf16.msra.mxu1 %v533_v17  ;;  %292 = vmatpush.bf16.msra.mxu2 %v542_v25 }
  0x1f   :  { %100 = vmatpush.bf16.msra.mxu0 %v523_v18 }
  0x21   :  { %195 = vmatmul.bf16.vlgmr.msra.gmra.mxu1 %v531_v20 }
  0x22   :  { %101 = vmatmul.bf16.vlgmr.msra.gmra.mxu0 %v522_v21  ;;  %293 = vmatpush.bf16.msra.mxu2 %v541_v26 }
  0x31   :  { %200 = vmatmul.bf16.gmra.mxu1 %v532_v22 }
  0x9e   :  { %v196_v27 = vpop.f32.mrf.mxu1 }
  0x9f   :  { %v206_v28 = vpack.c.bf16 %v196_v27, %v196_v27  ;;  %v102_v35 = vpop.f32.mrf.mxu0 }
  0xa0   :  { %v305_v36 = vpack.c.bf16 %v102_v35, %v102_v35 }
  0xa1   :  { %v230_v31 = vunpack.c.l.b16 %v206_v28 }
  0xa6   :  { %v198_v29 = vpop.f32.mrf.mxu1 }
  0xa7   :  { %v207_v30 = vpack.c.bf16 %v198_v29, %v198_v29  ;;  %v104_v43 = vpop.f32.mrf.mxu0 }
  0xa8   :  { %v306_v44 = vpack.c.bf16 %v104_v43, %v104_v43 }
  0xa9   :  { %v231_v32 = vunpack.c.l.b16 %v207_v30 }
  0xab   :  { %v234_v33 = vpack.c.b16 %v231_v32, %v230_v31 }
  0xad   :  { %294 = vmatmul.bf16.vlgmr.msra.gmra.mxu2 %v234_v33  ;;  %318 = vmatpush.bf16.xpose.msra.mxu3 %v234_v33 }
  0xae   :  { %v201_v34 = vpop.f32.mrf.mxu1 }
  0xaf   :  { %v208_v37 = vpack.c.bf16 %v201_v34, %v201_v34 }
  0xb1   :  { %v232_v40 = vunpack.c.l.b16 %v208_v37 }
  0xb4   :  { %319 = vmatmul.bf16.vlgmr.msra.gmra.mxu3 %v305_v36 }
  0xb6   :  { %v203_v38 = vpop.f32.mrf.mxu1 }
  0xb7   :  { %v209_v39 = vpack.c.bf16 %v203_v38, %v203_v38 }
  0xb9   :  { %v233_v41 = vunpack.c.l.b16 %v209_v39 }
  0xbb   :  { %v235_v42 = vpack.c.b16 %v233_v41, %v232_v40 }
  0xbd   :  { %299 = vmatmul.bf16.gmra.mxu2 %v235_v42  ;;  %331 = vmatpush.bf16.xpose.msrb.mxu3 %v235_v42 }
  0xc4   :  { %332 = vmatmul.bf16.vlgmr.msrb.gmra.mxu3 %v306_v44 }
 0x130   :  { %v295_v45 = vpop.f32.mrf.mxu2 }
 0x131   :  { %v307_v46 = vpack.c.bf16 %v295_v45, %v295_v45 }
 0x133   :  { %v364_v51 = vunpack.c.l.b16 %v307_v46 }
 0x137   :  { %v320_v47 = vpop.f32.mrf.mxu3 }
 0x138   :  { %v297_v48 = vpop.f32.mrf.mxu2  ;;  %v338_v49 = vsel %vm337_vm0, %v320_v47, -inf }
 0x139   :  { %v308_v50 = vpack.c.bf16 %v297_v48, %v297_v48  ;;  %339 = vmax.xlane.f32.xlu0 %v338_v49 }
 0x13b   :  { %v365_v52 = vunpack.c.l.b16 %v308_v50 }
 0x13d   :  { %v366_v53 = vpack.c.b16 %v365_v52, %v364_v51 }
 0x13f   :  { %v322_v54 = vpop.f32.mrf.mxu3  ;;  %378 = vmatpush.bf16.msra.mxu3 %v366_v53 }
 0x140   :  { %v300_v55 = vpop.f32.mrf.mxu2 }
 0x141   :  { %v309_v56 = vpack.c.bf16 %v300_v55, %v300_v55 }
 0x143   :  { %v386_v61 = vunpack.c.l.b16 %v309_v56 }
 0x147   :  { %v333_v57 = vpop.f32.mrf.mxu3 }
 0x148   :  { %v302_v58 = vpop.f32.mrf.mxu2  ;;  %v341_v59 = vsel %vm337_vm0, %v333_v57, -inf }
 0x149   :  { %v310_v60 = vpack.c.bf16 %v302_v58, %v302_v58  ;;  %342 = vmax.xlane.f32.xlu0 %v341_v59 }
 0x14b   :  { %v387_v62 = vunpack.c.l.b16 %v310_v60 }
 0x14d   :  { %v388_v63 = vpack.c.b16 %v387_v62, %v386_v61 }
 0x14f   :  { %v335_v0 = vpop.f32.mrf.mxu3  ;;  %400 = vmatpush.bf16.msrb.mxu0 %v388_v63 }
 0x1ac   :  { %v340_v1 = vpop.xlane.xlu0 %339 }
 0x1ad   :  { %v344_v2 = vsub.f32 %v320_v47, %v340_v1 }
 0x1af   :  { %v346_v3 = vmul.f32 1.442695, %v344_v2 }
 0x1b1   :  { %549 = vpow2.f32 %v346_v3 }
 0x1b7   :  { %v550_v4 = vpop.eup %549 }
 0x1b8   :  { %v350_v5 = vsel %vm337_vm0, %v550_v4, 0.0 }
 0x1b9   :  { %351 = vadd.xlane.f32.xlu1 %v350_v5 }
 0x1bc   :  { %v343_v6 = vpop.xlane.xlu0 %342 }
 0x1bd   :  { %v345_v7 = vsub.f32 %v333_v57, %v343_v6 }
 0x1bf   :  { %v348_v8 = vmul.f32 1.442695, %v345_v7 }
 0x1c1   :  { %551 = vpow2.f32 %v348_v8 }
 0x1c7   :  { %v552_v9 = vpop.eup %551 }
 0x1c8   :  { %v353_v10 = vsel %vm337_vm0, %v552_v9, 0.0 }
 0x1c9   :  { %354 = vadd.xlane.f32.xlu1 %v353_v10 }
 0x22c   :  { %v352_v11 = vpop.xlane.xlu1 %351 }
 0x22d   :  { %553 = vrcp.f32 %v352_v11 }
 0x233   :  { %v554_v12 = vpop.eup %553 }
 0x234   :  { %v358_v13 = vmul.f32 %v554_v12, %v550_v4 }
 0x236   :  { %v360_v14 = vpack.c.bf16 %v358_v13, %v358_v13 }
 0x238   :  { %520 = vmatmul.msk.bf16.vlgmr.msra.gmra.mxu3 %vm337_vm0, %v360_v14 }
 0x23c   :  { %v355_v15 = vpop.xlane.xlu1 %354 }
 0x23d   :  { %555 = vrcp.f32 %v355_v15 }
 0x243   :  { %v556_v16 = vpop.eup %555 }
 0x244   :  { %v359_v17 = vmul.f32 %v556_v16, %v552_v9 }
 0x246   :  { %v361_v18 = vpack.c.bf16 %v359_v17, %v359_v17 }
 0x248   :  { %521 = vmatmul.msk.bf16.vlgmr.msrb.gmra.mxu0 %vm337_vm0, %v361_v18 }
 0x2bb   :  { %v380_v19 = vpop.f32.mrf.mxu3 }
 0x2bc   :  { %406 = vst [vmem:[%s685_s5] sm:$0xff] %v380_v19 }
 0x2c3   :  { %v382_v20 = vpop.f32.mrf.mxu3 }
 0x2c5   :  { %v402_v21 = vpop.f32.mrf.mxu0 }
 0x2c6   :  { %407 = vst [vmem:[%s685_s5 + $0x8] sm:$0xff] %v402_v21 }
 0x2cd   :  { %v404_v22 = vpop.f32.mrf.mxu0 }

</bundles_post_ra>
